<compile_context>
chip_gen: v7x
topology: tpu7x:2x2x1
jax: 0.10.0
libtpu: 0.0.40
codegen_flags: <defaults>
</compile_context>

<pallas_src>
import jax
import jax.numpy as jnp
from jax.experimental import pallas as pl
from jax.experimental.pallas import tpu as pltpu


def _linear_block_kernel(x_ref, w_ref, b_ref, o_ref, acc_ref):
    """One grid step == one (row_tile x col_tile) output block, one K slice."""
    k = pl.program_id(2)

    @pl.when(k == 0)
    def _():
        acc_ref[...] = jnp.zeros_like(acc_ref)

    acc_ref[...] += jnp.dot(x_ref[...], w_ref[...],
                            preferred_element_type=jnp.float32)

    @pl.when(k == pl.num_programs(2) - 1)
    def _():
        # Bias broadcast (1, col_block) -> (row_block, col_block), added once.
        o_ref[...] = (acc_ref[...] + b_ref[...]).astype(o_ref.dtype)


def _pick_tile(total, target, align):
    """Largest divisor of `total` that is <= target and a multiple of `align`
    (or the full extent, which is always a legal block)."""
    for cand in range(min(total, target), 0, -1):
        if total % cand == 0 and (cand % align == 0 or cand == total):
            return cand
    return total


def split_forward_linear(x, w_t, b, batch_size, *,
                         row_target=512, col_target=1024, k_target=1024):
    """Pallas equivalent of SplitForwardModule(Linear, batch_size)(x).

    x:    (N, D)    float32   (N % batch_size == 0, as asserted by split_forward)
    w_t:  (D, OUT)  float32   (PyTorch Linear weight, pre-transposed)
    b:    (1, OUT)  float32
    """
    n, d = x.shape
    out = w_t.shape[1]
    # Same assertion as the PyTorch split_forward (tensor path).
    assert batch_size is not None and n % batch_size == 0, \
        "len(x) must be divisible by batch_size"

    # Chunked matmul == full matmul, so row tiling is independent of batch_size.
    row_block = _pick_tile(n, row_target, 8)      # f32 sublane alignment
    col_block = _pick_tile(out, col_target, 128)  # lane-dense output stores
    k_block = _pick_tile(d, k_target, 128)        # K slice (full D when small)

    n_rows = n // row_block
    n_cols = out // col_block
    n_k = d // k_block

    # Choose grid ordering to minimize HBM re-streaming when K fits in one
    # block: the operand constant along the inner axis stays VMEM-resident.
    itemsize = jnp.dtype(x.dtype).itemsize
    traffic_rows_outer = n * d + n_rows * d * out      # x once, W per row tile
    traffic_cols_outer = d * out + n_cols * n * d      # W once, x per col tile
    rows_outer = traffic_rows_outer <= traffic_cols_outer

    if rows_outer:
        grid = (n_rows, n_cols, n_k)
        x_map = lambda i, j, k: (i, k)
        w_map = lambda i, j, k: (k, j)
        b_map = lambda i, j, k: (0, j)
        o_map = lambda i, j, k: (i, j)
    else:
        grid = (n_cols, n_rows, n_k)
        x_map = lambda j, i, k: (i, k)
        w_map = lambda j, i, k: (k, j)
        b_map = lambda j, i, k: (0, j)
        o_map = lambda j, i, k: (i, j)

    # Explicit VMEM budget: double-buffered x/W/out blocks + bias + accumulator,
    # with 2x headroom.  Keeps the large-tile config valid on v7x (64 MiB VMEM).
    est_bytes = (2 * (row_block * k_block + k_block * col_block
                      + row_block * col_block) * itemsize
                 + 2 * col_block * itemsize
                 + row_block * col_block * 4)
    vmem_limit = int(min(100 * 1024 * 1024, max(32 * 1024 * 1024, 2 * est_bytes)))

    return pl.pallas_call(
        _linear_block_kernel,
        out_shape=jax.ShapeDtypeStruct((n, out), x.dtype),
        grid=grid,
        in_specs=[
            pl.BlockSpec((row_block, k_block), x_map),   # activation row tile
            pl.BlockSpec((k_block, col_block), w_map),   # weight column block
            pl.BlockSpec((1, col_block), b_map),         # bias column block
        ],
        out_specs=pl.BlockSpec((row_block, col_block), o_map),
        scratch_shapes=[pltpu.VMEM((row_block, col_block), jnp.float32)],
        compiler_params=pltpu.CompilerParams(
            dimension_semantics=("parallel", "parallel", "arbitrary"),
            vmem_limit_bytes=vmem_limit,
        ),
    )(x, w_t, b)


if __name__ == "__main__":
    # Small shapes consistent with the module: total batch N split into
    # chunks of `batch_size` by SplitForwardModule.
    N = 16          # total batch
    BATCH_SIZE = 8  # SplitForwardModule batch_size (N % BATCH_SIZE == 0)
    D = 32          # in_features of wrapped Linear
    OUT = 128       # out_features of wrapped Linear

    key = jax.random.PRNGKey(0)
    kx, kw, kb = jax.random.split(key, 3)

    x = jax.random.normal(kx, (N, D), dtype=jnp.float32)
    # PyTorch Linear weight shape is (OUT, D); pre-transpose to (D, OUT).
    w = jax.random.normal(kw, (OUT, D), dtype=jnp.float32) * 0.02
    b = jax.random.normal(kb, (1, OUT), dtype=jnp.float32) * 0.01
    w_t = w.T

    y = split_forward_linear(x, w_t, b, BATCH_SIZE)
    y = jax.block_until_ready(y)

    # Reference: explicit chunked forward + concat (split_forward semantics).
    chunks = [x[i * BATCH_SIZE:(i + 1) * BATCH_SIZE] for i in range(N // BATCH_SIZE)]
    ref = jnp.concatenate([c @ w_t + b for c in chunks], axis=0)

    assert y.shape == (N, OUT) and y.dtype == x.dtype
    assert jnp.allclose(y, ref, atol=1e-4, rtol=1e-4)
    print("KERNEL_OK")
</pallas_src>

<mosaic_0001>
module attributes {stable_mosaic.version = 11 : i64} {
  func.func @_linear_block_kernel(%arg0: i32, %arg1: i32, %arg2: i32, %arg3: memref<16x32xf32, #tpu.memory_space<vmem>>, %arg4: memref<32x128xf32, #tpu.memory_space<vmem>>, %arg5: memref<1x128xf32, #tpu.memory_space<vmem>>, %arg6: memref<16x128xf32, #tpu.memory_space<vmem>>, %arg7: memref<16x128xf32, #tpu.memory_space<vmem>>) attributes {dimension_semantics = [#tpu.dimension_semantics<parallel>, #tpu.dimension_semantics<parallel>, #tpu.dimension_semantics<arbitrary>], iteration_bounds = array<i64: 1, 1, 1>, scalar_prefetch = 0 : i64, scratch_operands = 1 : i64, tpu.core_type = #tpu.core_type<tc>, window_params = [{transform_indices = @transform_0, window_bounds = array<i64: 16, 32>}, {transform_indices = @transform_1, window_bounds = array<i64: 32, 128>}, {transform_indices = @transform_2, window_bounds = array<i64: 1, 128>}, {transform_indices = @transform_3, window_bounds = array<i64: 16, 128>}]} {
    %c0_i32 = arith.constant 0 : i32
    %0 = arith.cmpi eq, %arg2, %c0_i32 : i32
    %1 = arith.extui %0 : i1 to i32
    %c0_i32_0 = arith.constant 0 : i32
    %2 = arith.cmpi ne, %1, %c0_i32_0 : i32
    scf.if %2 {
      %cst_10 = arith.constant 0.000000e+00 : f32
      %12 = vector.broadcast %cst_10 : f32 to vector<16x128xf32>
      %c0_11 = arith.constant 0 : index
      %c0_12 = arith.constant 0 : index
      %13 = vector.load %arg7[%c0_11, %c0_12] : memref<16x128xf32, #tpu.memory_space<vmem>>, vector<16x128xf32>
      tpu.vector_store %arg7[%c0_11, %c0_12], %12 {strides = array<i32>} : memref<16x128xf32, #tpu.memory_space<vmem>>, vector<16x128xf32>,
    } else {
    }
    %c0 = arith.constant 0 : index
    %c0_1 = arith.constant 0 : index
    %3 = vector.load %arg7[%c0, %c0_1] : memref<16x128xf32, #tpu.memory_space<vmem>>, vector<16x128xf32>
    %c0_2 = arith.constant 0 : index
    %c0_3 = arith.constant 0 : index
    %4 = vector.load %arg3[%c0_2, %c0_3] : memref<16x32xf32, #tpu.memory_space<vmem>>, vector<16x32xf32>
    %c0_4 = arith.constant 0 : index
    %c0_5 = arith.constant 0 : index
    %5 = vector.load %arg4[%c0_4, %c0_5] : memref<32x128xf32, #tpu.memory_space<vmem>>, vector<32x128xf32>
    %cst = arith.constant dense<0.000000e+00> : vector<16x128xf32>
    %6 = tpu.matmul %4, %5, %cst {dimension_numbers = #tpu.dot_dimension_numbers<[1], [0], [0], [1], [0, 0, 1, 1], [], []>} : vector<16x32xf32>, vector<32x128xf32>, vector<16x128xf32> -> vector<16x128xf32>
    %7 = arith.addf %3, %6 : vector<16x128xf32>
    %c0_6 = arith.constant 0 : index
    %c0_7 = arith.constant 0 : index
    %8 = vector.load %arg7[%c0_6, %c0_7] : memref<16x128xf32, #tpu.memory_space<vmem>>, vector<16x128xf32>
    tpu.vector_store %arg7[%c0_6, %c0_7], %7 {strides = array<i32>} : memref<16x128xf32, #tpu.memory_space<vmem>>, vector<16x128xf32>,
    %c0_i32_8 = arith.constant 0 : i32
    %9 = arith.cmpi eq, %arg2, %c0_i32_8 : i32
    %10 = arith.extui %9 : i1 to i32
    %c0_i32_9 = arith.constant 0 : i32
    %11 = arith.cmpi ne, %10, %c0_i32_9 : i32
    scf.if %11 {
      %c0_10 = arith.constant 0 : index
      %c0_11 = arith.constant 0 : index
      %12 = vector.load %arg7[%c0_10, %c0_11] : memref<16x128xf32, #tpu.memory_space<vmem>>, vector<16x128xf32>
      %c0_12 = arith.constant 0 : index
      %c0_13 = arith.constant 0 : index
      %13 = vector.load %arg5[%c0_12, %c0_13] : memref<1x128xf32, #tpu.memory_space<vmem>>, vector<1x128xf32>
      %14 = vector.broadcast %13 : vector<1x128xf32> to vector<16x128xf32>
      %15 = arith.addf %12, %14 : vector<16x128xf32>
      %c0_14 = arith.constant 0 : index
      %c0_15 = arith.constant 0 : index
      %16 = vector.load %arg6[%c0_14, %c0_15] : memref<16x128xf32, #tpu.memory_space<vmem>>, vector<16x128xf32>
      tpu.vector_store %arg6[%c0_14, %c0_15], %15 {strides = array<i32>} : memref<16x128xf32, #tpu.memory_space<vmem>>, vector<16x128xf32>,
    } else {
    }
    return
  }
  func.func @transform_0(%arg0: i32, %arg1: i32, %arg2: i32) -> (i32, i32) {
    %c0_i32 = arith.constant 0 : i32
    return %arg0, %arg2 : i32, i32
  }
  func.func @transform_1(%arg0: i32, %arg1: i32, %arg2: i32) -> (i32, i32) {
    %c0_i32 = arith.constant 0 : i32
    return %arg2, %arg1 : i32, i32
  }
  func.func @transform_2(%arg0: i32, %arg1: i32, %arg2: i32) -> (i32, i32) {
    %c0_i32 = arith.constant 0 : i32
    %c0_i32_0 = arith.constant 0 : i32
    return %c0_i32, %arg1 : i32, i32
  }
  func.func @transform_3(%arg0: i32, %arg1: i32, %arg2: i32) -> (i32, i32) {
    %c0_i32 = arith.constant 0 : i32
    return %arg0, %arg1 : i32, i32
  }
}

</mosaic_0001>

<bundles_post_ra>
// kernel: tpu_custom_call.1
= control target key start
LH: loop header
LB: loop body
LE: loop exit
PB: predicated region body
PF: predicated region fallthrough
CT: control target
= control target key end

     0   :  { %8 = vsyncpa [#allocation4], 0  ;;  %s355_s0 = inlined_call_operand.hbm [shape: f32[16,32], index: 0, kind: input, shape index: {}]   ;;  %s356_s1 = inlined_call_operand.hbm [shape: f32[32,128], index: 1, kind: input, shape index: {}]   ;;  %s357_s2 = inlined_call_operand.vmem [shape: f32[1,128], index: 2, kind: input, shape index: {}]   ;;  %s358_s3 = inlined_call_operand.hbm [shape: f32[16,128], index: 3, kind: output, shape index: {}]  }
   0x1   :  { %9 = vsyncpa [#allocation7], 0 }
   0x2   :  { %10 = vsyncpa [#allocation5], 0  ;;  %s282_s12 = smov [#allocation3]   ;;  %s210_s16 = scalar_lea.hbm %s355_s0, 256 }
   0x3   :  { %s16_s13 = sshll.u32 %s282_s12, 4  ;;  %p211_p0 = scmp.ne.s32.totalorder %s355_s0, %s210_s16  ;;  %s17_s13 = int_to_ptr.vmem [resolvable:$true] %s16_s13 }
   0x4   :  { %p214_p1 = scmp.lt.u32.totalorder %s210_s16, %s355_s0 }
   0x6   :  { %p216_p2 = pnand %p214_p1, %p211_p0 }
   0x8   :  { %219 = shalt.err (!%p216_p2)
}
   0x9   :  { %s220_s21 = scalar_lea.vmem %s17_s13, 256  ;;  %p225_p4 = scmp.lt.s32.totalorder %s17_s13, %s17_s13 }
   0xa   :  { %p221_p3 = scmp.ne.s32.totalorder %s17_s13, %s220_s21  ;;  %p226_p5 = scmp.lt.s32.totalorder %s220_s21, %s220_s21 }
   0xc   :  { %p227_p6 = por %p226_p5, %p225_p4 }
   0xe   :  { %p228_p7 = pnand %p227_p6, %p221_p3 }
  0x10   :  { %231 = shalt.err (!%p228_p7)
}
  0x11   :  { %s283_s22 = smov 128   ;;  %s284_s23 = smov 8  }
  0x12   :  { %22 = dma.hbm_to_vmem [thread:$0]  %s355_s0, 256, %s17_s13, [#allocation4], %s283_s22, %s283_s22, %s284_s23  }
  0x13   :  { %s285_s26 = smov [#allocation6]   ;;  %s232_s30 = scalar_lea.hbm %s356_s1, 512 }
  0x14   :  { %s28_s27 = sshll.u32 %s285_s26, 4  ;;  %p233_p8 = scmp.ne.s32.totalorder %s356_s1, %s232_s30  ;;  %s29_s27 = int_to_ptr.vmem [resolvable:$true] %s28_s27 }
  0x15   :  { %p236_p9 = scmp.lt.u32.totalorder %s232_s30, %s356_s1 }
  0x17   :  { %p238_p10 = pnand %p236_p9, %p233_p8 }
  0x19   :  { %241 = shalt.err (!%p238_p10)
}
  0x1a   :  { %s242_s8 = scalar_lea.vmem %s29_s27, 512  ;;  %p247_p12 = scmp.lt.s32.totalorder %s29_s27, %s29_s27 }
  0x1b   :  { %p243_p11 = scmp.ne.s32.totalorder %s29_s27, %s242_s8  ;;  %p248_p13 = scmp.lt.s32.totalorder %s242_s8, %s242_s8 }
  0x1d   :  { %p249_p0 = por %p248_p13, %p247_p12 }
  0x1f   :  { %p250_p1 = pnand %p249_p0, %p243_p11 }
  0x21   :  { %253 = shalt.err (!%p250_p1)
}
  0x22   :  { %34 = dma.hbm_to_vmem [thread:$0]  %s356_s1, 512, %s29_s27, [#allocation7], %s283_s22, %s283_s22, %s284_s23  }
  0x23   :  { %276 = dma.done.wait [#allocation4], 256  }
  0x24   :  { %277 = vsyncadd [#allocation4], 4294967040 }
  0x25   :  { %278 = dma.done.wait [#allocation7], 512  }
  0x26   :  { %279 = vsyncadd [#allocation7], 4294966784  ;;  %vm57_vm0 = vcmask 261120   ;;  %v53_v0 = vld [vmem:[#allocation6] sm:$0xff]  ;;  %v54_v1 = vld [vmem:[#allocation6 + $0x8] sm:$0xff]  ;;  %s286_s11 = smov [#allocation8]  }
  0x27   :  { %v55_v2 = vld [vmem:[#allocation6 + $0x10] sm:$0xff]  ;;  %v197_v3 = vpack.c.bf16 %v54_v1, %v53_v0  ;;  %v56_v4 = vld [vmem:[#allocation6 + $0x18] sm:$0xff]  ;;  %s164_s12 = sshll.u32 %s286_s11, 4  ;;  %s165_s12 = int_to_ptr.vmem [resolvable:$true] %s164_s12 }
  0x28   :  { %v51_v5 = vld [vmem:[#allocation3] sm:$0xff]  ;;  %v201_v6 = vpack.c.bf16 %v56_v4, %v55_v2  ;;  %v52_v7 = vld [vmem:[#allocation3 + $0x8] sm:$0xff]  ;;  %s254_s13 = scalar_lea.vmem %s165_s12, 256  ;;  %p259_p3 = scmp.lt.s32.totalorder %s165_s12, %s165_s12 }
  0x29   :  { %194 = vmatprep.mubr.msk.f32.mxu0 %vm57_vm0, %v51_v5  ;;  %198 = vmatprep.subr.bf16.mxu0 %v197_v3  ;;  %v179_v8 = vld [vmem:[%s357_s2] ss:$0 sm:$0xff]  ;;  %p255_p2 = scmp.ne.s32.totalorder %s165_s12, %s254_s13  ;;  %p260_p4 = scmp.lt.s32.totalorder %s254_s13, %s254_s13 }
  0x2a   :  { %200 = vmatpush3.bf16.msra.mxu0 %v197_v3 }
  0x2b   :  { %202 = vmatprep.subr.bf16.mxu0 %v201_v6  ;;  %p261_p5 = por %p260_p4, %p259_p3 }
  0x2d   :  { %p262_p6 = pnand %p261_p5, %p255_p2 }
  0x2e   :  { %204 = vmatpush3.bf16.msra.mxu0 %v201_v6 }
  0x31   :  { %195 = vmatmul.mubr.msk.f32.vlgmr.msra.gmra.mrb[0].mxu0 %vm57_vm0, %v52_v7 }
 0x104   :  { %v196_v9 = vpop.f32.mrb[0].mxu0 }
 0x105   :  { %v156_v10 = vadd.f32 %v196_v9, %v179_v8  ;;  %v130_v11 = vpop.f32.mrb[1].mxu0 }
 0x106   :  { %v155_v12 = vadd.f32 %v179_v8, %v130_v11 }
 0x107   :  { %158 = vst [vmem:[#allocation8 + $0x8] sm:$0xff] %v156_v10 }
 0x108   :  { %157 = vst [vmem:[#allocation8] sm:$0xff] %v155_v12 }
 0x109   :  { %265 = shalt.err (!%p262_p6)
}
 0x10a   :  { %s266_s2 = scalar_lea.hbm %s358_s3, 256 }
 0x10b   :  { %p267_p7 = scmp.ne.s32.totalorder %s358_s3, %s266_s2  ;;  %p270_p8 = scmp.lt.u32.totalorder %s266_s2, %s358_s3 }
 0x10d   :  { %p272_p9 = pnand %p270_p8, %p267_p7 }
 0x10f   :  { %275 = shalt.err (!%p272_p9)
}
 0x110   :  { %170 = dma.vmem_to_hbm [thread:$0]  %s165_s12, 256, %s358_s3, [#allocation5], %s283_s22, %s283_s22, %s284_s23  }
 0x111   :  { %280 = dma.done.wait [#allocation5], 256  }
 0x112   :  { %281 = vsyncadd [#allocation5], 4294967040 }
 0x113   :  { %174 = vsyncpa [#allocation4], 1 }
 0x114   :  { %175 = vsyncpa [#allocation7], 1 }
 0x115   :  { %176 = vsyncpa [#allocation5], 1 }

</bundles_post_ra>
